<compile_context>
chip_gen: v5e
topology: v5e:2x2
jax: 0.10.0
libtpu: 0.0.40
codegen_flags: <defaults>
</compile_context>

<pallas_src>
import math

import jax
import jax.numpy as jnp
from jax.experimental import pallas as pl
from jax.experimental.pallas import tpu as pltpu

LANE = 128


# --------------------------- Geometric series helper --------------------------

def generate_geometric_series(min_n: int, max_n: int, reverse: bool = False):
    series = [int(2.0 ** i) for i in range(int(min_n), int(max_n) + 1)]
    if reverse:
        series.reverse()
    return series


def _round_up(x: int, m: int) -> int:
    return ((x + m - 1) // m) * m


# ------------------------------- Pallas kernel --------------------------------

def _make_fused_kernel(n_layers: int, epilogue_dtype):
    """Build the fused kernel for `n_layers` geometric steps (Python loop unrolls)."""

    def kernel(*refs):
        # refs = (x_ref, w0_ref, p0_ref, w1_ref, p1_ref, ..., o_ref)
        x_ref = refs[0]
        o_ref = refs[-1]
        h = x_ref[...]                                   # (tb, Din), bf16 — feeds MXU directly
        for l in range(n_layers):
            w = refs[1 + 2 * l][...]                     # (d_in_p, d_out_p), bf16
            p = refs[2 + 2 * l][...].astype(epilogue_dtype)  # (3, d_out_p): bias/scale/shift
            b, scale, shift = p[0:1, :], p[1:2, :], p[2:3, :]
            # MXU matmul: bf16 inputs, f32 accumulation.
            y = jnp.dot(h.astype(w.dtype), w, preferred_element_type=jnp.float32)
            y = y.astype(epilogue_dtype)                 # bf16 VPU epilogue (v6e/v7x)
            y = jnp.maximum(y + b, 0)                    # Linear + relu (Dropout = eval no-op)
            y = jnp.maximum(y * scale + shift, 0)        # folded BatchNorm1d (eval) + relu
            h = y                                        # stays in vregs; never hits HBM
        o_ref[...] = h.astype(o_ref.dtype)

    return kernel


def geometric_step_up_dense_forward(x, kernel_params, *, block_batch: int = 256,
                                    out_dtype=jnp.bfloat16,
                                    epilogue_dtype=jnp.bfloat16):
    """Fused forward: one pallas_call for the entire geometric chain.

    kernel_params: list of (w, pack) with w: (d_in_p, d_out_p) bf16 (lane-padded),
                   pack: (3, d_out_p) f32 holding [bias; bn_scale; bn_shift].

    block_batch=256 fills the v6e/v7x MXU M dimension (multiple of 128 for v5e);
    the batch grid axis is "parallel" so multi-block grids shard across v7x's 2 TCs.
    """
    B, Din = x.shape
    n_layers = len(kernel_params)
    d_out_final = kernel_params[-1][0].shape[1]

    # bf16 input: halves input DMA bytes, MXU consumes bf16 anyway.
    x_in = x.astype(jnp.bfloat16)

    # Batch tiling: single block for small batches; block_batch-row tiles otherwise.
    # Weights stay pinned in VMEM via constant index_map. If B is not a multiple of tb,
    # the last block computes on padded rows; the writeback is masked so outputs are correct.
    tb = B if B <= block_batch else block_batch
    grid = (pl.cdiv(B, tb),)

    in_specs = [pl.BlockSpec((tb, Din), lambda i: (i, 0))]
    flat_inputs = [x_in]
    for (w, p) in kernel_params:
        in_specs.append(pl.BlockSpec(w.shape, lambda i: (0, 0)))   # resident weight
        in_specs.append(pl.BlockSpec(p.shape, lambda i: (0, 0)))   # resident bias/BN pack
        flat_inputs.extend([w, p])
    # NOTE: weight/pack specs could be single-buffered (pipeline_mode=pl.Buffered(1));
    # skipped as low-priority hygiene — the buffers are tiny.

    out_specs = pl.BlockSpec((tb, d_out_final), lambda i: (i, 0))

    # Advisory cost estimate for XLA scheduling (kept in sync with bf16 I/O byte counts).
    flops = 0
    d_in = Din
    for (w, _) in kernel_params:
        d_out = w.shape[1]
        flops += 2 * B * d_in * d_out + 4 * B * d_out
        d_in = d_out
    bytes_accessed = sum(int(a.size) * a.dtype.itemsize for a in flat_inputs)
    bytes_accessed += B * d_out_final * jnp.dtype(out_dtype).itemsize

    return pl.pallas_call(
        _make_fused_kernel(n_layers, epilogue_dtype),
        out_shape=jax.ShapeDtypeStruct((B, d_out_final), out_dtype),
        grid=grid,
        in_specs=in_specs,
        out_specs=out_specs,
        compiler_params=pltpu.CompilerParams(
            dimension_semantics=("parallel",)),
        cost_estimate=pl.CostEstimate(
            flops=flops, transcendentals=0, bytes_accessed=bytes_accessed),
    )(*flat_inputs)


# --------------------------- Parameter construction ---------------------------

def init_params(key, input_dim: int, max_n: int = 8, eps: float = 1e-5):
    """Deterministic synthetic f32 parameters matching the module's layer shapes.

    Linear weight stored as (d_in, units) — transposed vs PyTorch (units, d_in) —
    so the kernel computes x @ W directly on the MXU.  BatchNorm (eval) is folded
    into an affine scale/shift.
    """
    min_n = math.floor(math.log2(input_dim))
    series = generate_geometric_series(min_n, max_n, reverse=False)

    params = []
    d_in = input_dim
    for units in series:
        key, kw, kb, kg, kbe, km, kv = jax.random.split(key, 7)
        bound = 1.0 / math.sqrt(d_in)
        w = jax.random.uniform(kw, (d_in, units), jnp.float32, -bound, bound)
        b = jax.random.uniform(kb, (1, units), jnp.float32, -bound, bound)
        gamma = 1.0 + 0.1 * jax.random.normal(kg, (1, units), jnp.float32)
        beta = 0.05 * jax.random.normal(kbe, (1, units), jnp.float32)
        running_mean = 0.1 * jax.random.normal(km, (1, units), jnp.float32)
        running_var = 1.0 + 0.2 * jax.random.uniform(kv, (1, units), jnp.float32)
        scale = gamma / jnp.sqrt(running_var + eps)
        shift = beta - running_mean * scale
        params.append(dict(w=w, b=b, scale=scale, shift=shift))
        d_in = units
    return params, series


def prepare_kernel_params(params, input_dim: int, weight_dtype=jnp.bfloat16, lane=LANE):
    """Pad intermediate widths to 128-lane multiples, fold bias/BN into a (3, d) pack,
    and cast weights to bf16.  Padded W columns / bias / scale / shift are zero, so
    padded activations stay exactly 0 through relu and feed zero rows of the next W —
    the real outputs are bit-identical to the unpadded math.  The final layer is left
    at its true width so the output shape matches the module.
    """
    kernel_params = []
    d_in_true = input_dim
    d_in_pad = input_dim
    n = len(params)
    for i, p in enumerate(params):
        d_out_true = p["w"].shape[1]
        d_out_pad = d_out_true if i == n - 1 else _round_up(d_out_true, lane)
        w_pad = jnp.zeros((d_in_pad, d_out_pad), jnp.float32)
        w_pad = w_pad.at[:d_in_true, :d_out_true].set(p["w"])
        pack = jnp.zeros((3, d_out_pad), jnp.float32)
        pack = pack.at[0, :d_out_true].set(p["b"][0])
        pack = pack.at[1, :d_out_true].set(p["scale"][0])
        pack = pack.at[2, :d_out_true].set(p["shift"][0])
        kernel_params.append((w_pad.astype(weight_dtype), pack))
        d_in_true = d_out_true
        d_in_pad = d_out_pad
    return kernel_params


# --------------------------------- References ----------------------------------

def reference_forward_matched(x, kernel_params, epilogue_dtype=jnp.bfloat16,
                              out_dtype=jnp.bfloat16):
    """Pure-JAX reference with the SAME dtype handling as the kernel."""
    h = x.astype(jnp.bfloat16)
    for (w, p) in kernel_params:
        pe = p.astype(epilogue_dtype)
        b, scale, shift = pe[0:1, :], pe[1:2, :], pe[2:3, :]
        y = jnp.dot(h.astype(w.dtype), w, preferred_element_type=jnp.float32)
        y = y.astype(epilogue_dtype)
        y = jnp.maximum(y + b, 0)
        y = jnp.maximum(y * scale + shift, 0)
        h = y
    return h.astype(out_dtype)


def reference_forward_f32(x, params):
    """Full-f32 eval-mode module semantics for a loose end-to-end check."""
    h = x.astype(jnp.float32)
    for p in params:
        y = jnp.maximum(h @ p["w"] + p["b"], 0.0)
        y = jnp.maximum(y * p["scale"] + p["shift"], 0.0)
        h = y
    return h


# ------------------------------------ Main -------------------------------------

if __name__ == "__main__":
    key = jax.random.PRNGKey(0)
    key, kx, kp = jax.random.split(key, 3)

    batch = 8
    input_dim = 32
    max_n = 8  # -> series [32, 64, 128, 256]; network: 32 -> 32 -> 64 -> 128 -> 256

    params, series = init_params(kp, input_dim, max_n=max_n)
    kparams = prepare_kernel_params(params, input_dim)

    x = jax.random.normal(kx, (batch, input_dim), jnp.float32)

    # TODO(synk): training-mode Dropout masking / BatchNorm batch statistics are not
    # implemented; this is the eval-mode forward (matching module.eval() semantics).
    # NOTE: bf16 weights / bf16 I/O are an intentional deviation from the f32 PyTorch
    # module (loose-tolerance check below); pass weight_dtype/out_dtype/epilogue_dtype
    # = jnp.float32 for strict-parity (or v5e) paths.

    fwd = jax.jit(lambda xx, pp: geometric_step_up_dense_forward(xx, pp))

    # ---- Small-batch case (grid collapses to 1 block) ----
    out = jax.block_until_ready(fwd(x, kparams))
    assert out.shape == (batch, series[-1]), (out.shape, series)
    assert out.dtype == jnp.bfloat16

    ref_matched = reference_forward_matched(x, kparams)
    ref_f32 = reference_forward_f32(x, params)
    out_f = out.astype(jnp.float32)
    # Tight check against a reference with identical bf16/f32 dtype handling.
    assert jnp.allclose(out_f, ref_matched.astype(jnp.float32), atol=2e-2, rtol=2e-2), \
        "Pallas output mismatch vs dtype-matched reference"
    # Loose end-to-end check against full-f32 module semantics (bf16 rounding tolerance).
    assert jnp.allclose(out_f, ref_f32, atol=1e-1, rtol=1e-1), \
        "Pallas output mismatch vs f32 reference"

    # ---- Multi-block case: exercises the parallel batch grid and the padded last block ----
    key, kx2 = jax.random.split(key)
    x2 = jax.random.normal(kx2, (384, input_dim), jnp.float32)   # 2 grid steps at tb=256
    out2 = jax.block_until_ready(fwd(x2, kparams))
    assert out2.shape == (384, series[-1])
    ref2_matched = reference_forward_matched(x2, kparams)
    ref2_f32 = reference_forward_f32(x2, params)
    assert jnp.allclose(out2.astype(jnp.float32), ref2_matched.astype(jnp.float32),
                        atol=2e-2, rtol=2e-2), "Multi-block mismatch vs matched reference"
    assert jnp.allclose(out2.astype(jnp.float32), ref2_f32, atol=1e-1, rtol=1e-1), \
        "Multi-block mismatch vs f32 reference"

    print("KERNEL_OK")
</pallas_src>

<mosaic_0001>
module attributes {stable_mosaic.version = 11 : i64} {
  func.func @kernel(%arg0: i32, %arg1: memref<8x32xbf16, #tpu.memory_space<vmem>>, %arg2: memref<32x128xbf16, #tpu.memory_space<vmem>>, %arg3: memref<3x128xf32, #tpu.memory_space<vmem>>, %arg4: memref<128x128xbf16, #tpu.memory_space<vmem>>, %arg5: memref<3x128xf32, #tpu.memory_space<vmem>>, %arg6: memref<128x128xbf16, #tpu.memory_space<vmem>>, %arg7: memref<3x128xf32, #tpu.memory_space<vmem>>, %arg8: memref<128x256xbf16, #tpu.memory_space<vmem>>, %arg9: memref<3x256xf32, #tpu.memory_space<vmem>>, %arg10: memref<8x256xbf16, #tpu.memory_space<vmem>>) attributes {dimension_semantics = [#tpu.dimension_semantics<parallel>], iteration_bounds = array<i64: 1>, scalar_prefetch = 0 : i64, scratch_operands = 0 : i64, tpu.core_type = #tpu.core_type<tc>, window_params = [{transform_indices = @transform_0, window_bounds = array<i64: 8, 32>}, {pipeline_mode = #tpu.pipeline_mode<synchronous>, transform_indices = @transform_1, window_bounds = array<i64: 32, 128>}, {pipeline_mode = #tpu.pipeline_mode<synchronous>, transform_indices = @transform_2, window_bounds = array<i64: 3, 128>}, {pipeline_mode = #tpu.pipeline_mode<synchronous>, transform_indices = @transform_3, window_bounds = array<i64: 128, 128>}, {pipeline_mode = #tpu.pipeline_mode<synchronous>, transform_indices = @transform_4, window_bounds = array<i64: 3, 128>}, {pipeline_mode = #tpu.pipeline_mode<synchronous>, transform_indices = @transform_5, window_bounds = array<i64: 128, 128>}, {pipeline_mode = #tpu.pipeline_mode<synchronous>, transform_indices = @transform_6, window_bounds = array<i64: 3, 128>}, {pipeline_mode = #tpu.pipeline_mode<synchronous>, transform_indices = @transform_7, window_bounds = array<i64: 128, 256>}, {pipeline_mode = #tpu.pipeline_mode<synchronous>, transform_indices = @transform_8, window_bounds = array<i64: 3, 256>}, {transform_indices = @transform_9, window_bounds = array<i64: 8, 256>}]} {
    %c0 = arith.constant 0 : index
    %c0_0 = arith.constant 0 : index
    %0 = vector.load %arg1[%c0, %c0_0] : memref<8x32xbf16, #tpu.memory_space<vmem>>, vector<8x32xbf16>
    %c0_1 = arith.constant 0 : index
    %c0_2 = arith.constant 0 : index
    %1 = vector.load %arg2[%c0_1, %c0_2] : memref<32x128xbf16, #tpu.memory_space<vmem>>, vector<32x128xbf16>
    %c0_3 = arith.constant 0 : index
    %c0_4 = arith.constant 0 : index
    %2 = vector.load %arg3[%c0_3, %c0_4] : memref<3x128xf32, #tpu.memory_space<vmem>>, vector<3x128xf32>
    %3 = arith.truncf %2 : vector<3x128xf32> to vector<3x128xbf16>
    %4 = vector.extract_strided_slice %3 {offsets = [0, 0], sizes = [1, 128], strides = [1, 1]} : vector<3x128xbf16> to vector<1x128xbf16>
    %5 = vector.extract_strided_slice %3 {offsets = [1, 0], sizes = [1, 128], strides = [1, 1]} : vector<3x128xbf16> to vector<1x128xbf16>
    %6 = vector.extract_strided_slice %3 {offsets = [2, 0], sizes = [1, 128], strides = [1, 1]} : vector<3x128xbf16> to vector<1x128xbf16>
    %cst = arith.constant dense<0.000000e+00> : vector<8x128xf32>
    %7 = tpu.matmul %0, %1, %cst {dimension_numbers = #tpu.dot_dimension_numbers<[1], [0], [0], [1], [0, 0, 1, 1], [], []>} : vector<8x32xbf16>, vector<32x128xbf16>, vector<8x128xf32> -> vector<8x128xf32>
    %8 = arith.truncf %7 : vector<8x128xf32> to vector<8x128xbf16>
    %9 = vector.broadcast %4 : vector<1x128xbf16> to vector<8x128xbf16>
    %10 = arith.addf %8, %9 : vector<8x128xbf16>
    %cst_5 = arith.constant 0.000000e+00 : bf16
    %11 = vector.broadcast %cst_5 : bf16 to vector<8x128xbf16>
    %12 = arith.maximumf %10, %11 : vector<8x128xbf16>
    %13 = vector.broadcast %5 : vector<1x128xbf16> to vector<8x128xbf16>
    %14 = arith.mulf %12, %13 : vector<8x128xbf16>
    %15 = vector.broadcast %6 : vector<1x128xbf16> to vector<8x128xbf16>
    %16 = arith.addf %14, %15 : vector<8x128xbf16>
    %cst_6 = arith.constant 0.000000e+00 : bf16
    %17 = vector.broadcast %cst_6 : bf16 to vector<8x128xbf16>
    %18 = arith.maximumf %16, %17 : vector<8x128xbf16>
    %c0_7 = arith.constant 0 : index
    %c0_8 = arith.constant 0 : index
    %19 = vector.load %arg4[%c0_7, %c0_8] : memref<128x128xbf16, #tpu.memory_space<vmem>>, vector<128x128xbf16>
    %c0_9 = arith.constant 0 : index
    %c0_10 = arith.constant 0 : index
    %20 = vector.load %arg5[%c0_9, %c0_10] : memref<3x128xf32, #tpu.memory_space<vmem>>, vector<3x128xf32>
    %21 = arith.truncf %20 : vector<3x128xf32> to vector<3x128xbf16>
    %22 = vector.extract_strided_slice %21 {offsets = [0, 0], sizes = [1, 128], strides = [1, 1]} : vector<3x128xbf16> to vector<1x128xbf16>
    %23 = vector.extract_strided_slice %21 {offsets = [1, 0], sizes = [1, 128], strides = [1, 1]} : vector<3x128xbf16> to vector<1x128xbf16>
    %24 = vector.extract_strided_slice %21 {offsets = [2, 0], sizes = [1, 128], strides = [1, 1]} : vector<3x128xbf16> to vector<1x128xbf16>
    %cst_11 = arith.constant dense<0.000000e+00> : vector<8x128xf32>
    %25 = tpu.matmul %18, %19, %cst_11 {dimension_numbers = #tpu.dot_dimension_numbers<[1], [0], [0], [1], [0, 0, 1, 1], [], []>} : vector<8x128xbf16>, vector<128x128xbf16>, vector<8x128xf32> -> vector<8x128xf32>
    %26 = arith.truncf %25 : vector<8x128xf32> to vector<8x128xbf16>
    %27 = vector.broadcast %22 : vector<1x128xbf16> to vector<8x128xbf16>
    %28 = arith.addf %26, %27 : vector<8x128xbf16>
    %cst_12 = arith.constant 0.000000e+00 : bf16
    %29 = vector.broadcast %cst_12 : bf16 to vector<8x128xbf16>
    %30 = arith.maximumf %28, %29 : vector<8x128xbf16>
    %31 = vector.broadcast %23 : vector<1x128xbf16> to vector<8x128xbf16>
    %32 = arith.mulf %30, %31 : vector<8x128xbf16>
    %33 = vector.broadcast %24 : vector<1x128xbf16> to vector<8x128xbf16>
    %34 = arith.addf %32, %33 : vector<8x128xbf16>
    %cst_13 = arith.constant 0.000000e+00 : bf16
    %35 = vector.broadcast %cst_13 : bf16 to vector<8x128xbf16>
    %36 = arith.maximumf %34, %35 : vector<8x128xbf16>
    %c0_14 = arith.constant 0 : index
    %c0_15 = arith.constant 0 : index
    %37 = vector.load %arg6[%c0_14, %c0_15] : memref<128x128xbf16, #tpu.memory_space<vmem>>, vector<128x128xbf16>
    %c0_16 = arith.constant 0 : index
    %c0_17 = arith.constant 0 : index
    %38 = vector.load %arg7[%c0_16, %c0_17] : memref<3x128xf32, #tpu.memory_space<vmem>>, vector<3x128xf32>
    %39 = arith.truncf %38 : vector<3x128xf32> to vector<3x128xbf16>
    %40 = vector.extract_strided_slice %39 {offsets = [0, 0], sizes = [1, 128], strides = [1, 1]} : vector<3x128xbf16> to vector<1x128xbf16>
    %41 = vector.extract_strided_slice %39 {offsets = [1, 0], sizes = [1, 128], strides = [1, 1]} : vector<3x128xbf16> to vector<1x128xbf16>
    %42 = vector.extract_strided_slice %39 {offsets = [2, 0], sizes = [1, 128], strides = [1, 1]} : vector<3x128xbf16> to vector<1x128xbf16>
    %cst_18 = arith.constant dense<0.000000e+00> : vector<8x128xf32>
    %43 = tpu.matmul %36, %37, %cst_18 {dimension_numbers = #tpu.dot_dimension_numbers<[1], [0], [0], [1], [0, 0, 1, 1], [], []>} : vector<8x128xbf16>, vector<128x128xbf16>, vector<8x128xf32> -> vector<8x128xf32>
    %44 = arith.truncf %43 : vector<8x128xf32> to vector<8x128xbf16>
    %45 = vector.broadcast %40 : vector<1x128xbf16> to vector<8x128xbf16>
    %46 = arith.addf %44, %45 : vector<8x128xbf16>
    %cst_19 = arith.constant 0.000000e+00 : bf16
    %47 = vector.broadcast %cst_19 : bf16 to vector<8x128xbf16>
    %48 = arith.maximumf %46, %47 : vector<8x128xbf16>
    %49 = vector.broadcast %41 : vector<1x128xbf16> to vector<8x128xbf16>
    %50 = arith.mulf %48, %49 : vector<8x128xbf16>
    %51 = vector.broadcast %42 : vector<1x128xbf16> to vector<8x128xbf16>
    %52 = arith.addf %50, %51 : vector<8x128xbf16>
    %cst_20 = arith.constant 0.000000e+00 : bf16
    %53 = vector.broadcast %cst_20 : bf16 to vector<8x128xbf16>
    %54 = arith.maximumf %52, %53 : vector<8x128xbf16>
    %c0_21 = arith.constant 0 : index
    %c0_22 = arith.constant 0 : index
    %55 = vector.load %arg8[%c0_21, %c0_22] : memref<128x256xbf16, #tpu.memory_space<vmem>>, vector<128x256xbf16>
    %c0_23 = arith.constant 0 : index
    %c0_24 = arith.constant 0 : index
    %56 = vector.load %arg9[%c0_23, %c0_24] : memref<3x256xf32, #tpu.memory_space<vmem>>, vector<3x256xf32>
    %57 = arith.truncf %56 : vector<3x256xf32> to vector<3x256xbf16>
    %58 = vector.extract_strided_slice %57 {offsets = [0, 0], sizes = [1, 256], strides = [1, 1]} : vector<3x256xbf16> to vector<1x256xbf16>
    %59 = vector.extract_strided_slice %57 {offsets = [1, 0], sizes = [1, 256], strides = [1, 1]} : vector<3x256xbf16> to vector<1x256xbf16>
    %60 = vector.extract_strided_slice %57 {offsets = [2, 0], sizes = [1, 256], strides = [1, 1]} : vector<3x256xbf16> to vector<1x256xbf16>
    %cst_25 = arith.constant dense<0.000000e+00> : vector<8x256xf32>
    %61 = tpu.matmul %54, %55, %cst_25 {dimension_numbers = #tpu.dot_dimension_numbers<[1], [0], [0], [1], [0, 0, 1, 1], [], []>} : vector<8x128xbf16>, vector<128x256xbf16>, vector<8x256xf32> -> vector<8x256xf32>
    %62 = arith.truncf %61 : vector<8x256xf32> to vector<8x256xbf16>
    %63 = vector.broadcast %58 : vector<1x256xbf16> to vector<8x256xbf16>
    %64 = arith.addf %62, %63 : vector<8x256xbf16>
    %cst_26 = arith.constant 0.000000e+00 : bf16
    %65 = vector.broadcast %cst_26 : bf16 to vector<8x256xbf16>
    %66 = arith.maximumf %64, %65 : vector<8x256xbf16>
    %67 = vector.broadcast %59 : vector<1x256xbf16> to vector<8x256xbf16>
    %68 = arith.mulf %66, %67 : vector<8x256xbf16>
    %69 = vector.broadcast %60 : vector<1x256xbf16> to vector<8x256xbf16>
    %70 = arith.addf %68, %69 : vector<8x256xbf16>
    %cst_27 = arith.constant 0.000000e+00 : bf16
    %71 = vector.broadcast %cst_27 : bf16 to vector<8x256xbf16>
    %72 = arith.maximumf %70, %71 : vector<8x256xbf16>
    %c0_28 = arith.constant 0 : index
    %c0_29 = arith.constant 0 : index
    %73 = vector.load %arg10[%c0_28, %c0_29] : memref<8x256xbf16, #tpu.memory_space<vmem>>, vector<8x256xbf16>
    tpu.vector_store %arg10[%c0_28, %c0_29], %72 {strides = array<i32>} : memref<8x256xbf16, #tpu.memory_space<vmem>>, vector<8x256xbf16>,
    return
  }
  func.func @transform_0(%arg0: i32) -> (i32, i32) {
    %c0_i32 = arith.constant 0 : i32
    %c0_i32_0 = arith.constant 0 : i32
    return %arg0, %c0_i32 : i32, i32
  }
  func.func @transform_1(%arg0: i32) -> (i32, i32) {
    %c0_i32 = arith.constant 0 : i32
    %c0_i32_0 = arith.constant 0 : i32
    %c0_i32_1 = arith.constant 0 : i32
    return %c0_i32, %c0_i32_0 : i32, i32
  }
  func.func @transform_2(%arg0: i32) -> (i32, i32) {
    %c0_i32 = arith.constant 0 : i32
    %c0_i32_0 = arith.constant 0 : i32
    %c0_i32_1 = arith.constant 0 : i32
    return %c0_i32, %c0_i32_0 : i32, i32
  }
  func.func @transform_3(%arg0: i32) -> (i32, i32) {
    %c0_i32 = arith.constant 0 : i32
    %c0_i32_0 = arith.constant 0 : i32
    %c0_i32_1 = arith.constant 0 : i32
    return %c0_i32, %c0_i32_0 : i32, i32
  }
  func.func @transform_4(%arg0: i32) -> (i32, i32) {
    %c0_i32 = arith.constant 0 : i32
    %c0_i32_0 = arith.constant 0 : i32
    %c0_i32_1 = arith.constant 0 : i32
    return %c0_i32, %c0_i32_0 : i32, i32
  }
  func.func @transform_5(%arg0: i32) -> (i32, i32) {
    %c0_i32 = arith.constant 0 : i32
    %c0_i32_0 = arith.constant 0 : i32
    %c0_i32_1 = arith.constant 0 : i32
    return %c0_i32, %c0_i32_0 : i32, i32
  }
  func.func @transform_6(%arg0: i32) -> (i32, i32) {
    %c0_i32 = arith.constant 0 : i32
    %c0_i32_0 = arith.constant 0 : i32
    %c0_i32_1 = arith.constant 0 : i32
    return %c0_i32, %c0_i32_0 : i32, i32
  }
  func.func @transform_7(%arg0: i32) -> (i32, i32) {
    %c0_i32 = arith.constant 0 : i32
    %c0_i32_0 = arith.constant 0 : i32
    %c0_i32_1 = arith.constant 0 : i32
    return %c0_i32, %c0_i32_0 : i32, i32
  }
  func.func @transform_8(%arg0: i32) -> (i32, i32) {
    %c0_i32 = arith.constant 0 : i32
    %c0_i32_0 = arith.constant 0 : i32
    %c0_i32_1 = arith.constant 0 : i32
    return %c0_i32, %c0_i32_0 : i32, i32
  }
  func.func @transform_9(%arg0: i32) -> (i32, i32) {
    %c0_i32 = arith.constant 0 : i32
    %c0_i32_0 = arith.constant 0 : i32
    return %arg0, %c0_i32 : i32, i32
  }
}

</mosaic_0001>

<bundles_post_ra>
// kernel: _lambda_.1
= control target key start
LH: loop header
LB: loop body
LE: loop exit
PB: predicated region body
PF: predicated region fallthrough
CT: control target
= control target key end

     0   :  { %14 = vsyncpa [#allocation3], 0  ;;  %s1016_s0 = inlined_call_operand.vmem [shape: bf16[8,32], index: 0, kind: input, shape index: {}]   ;;  %s1017_s1 = inlined_call_operand.hbm [shape: bf16[32,128], index: 1, kind: input, shape index: {}]   ;;  %s1018_s2 = inlined_call_operand.vmem [shape: f32[3,128], index: 2, kind: input, shape index: {}]   ;;  %s1019_s3 = inlined_call_operand.hbm [shape: bf16[128,128], index: 3, kind: input, shape index: {}]   ;;  %s1020_s4 = inlined_call_operand.hbm [shape: f32[3,128], index: 4, kind: input, shape index: {}]   ;;  %s1021_s5 = inlined_call_operand.hbm [shape: bf16[128,128], index: 5, kind: input, shape index: {}]   ;;  %s1022_s6 = inlined_call_operand.vmem [shape: f32[3,128], index: 6, kind: input, shape index: {}]   ;;  %s1023_s7 = inlined_call_operand.hbm [shape: bf16[128,256], index: 7, kind: input, shape index: {}]   ;;  %s1024_s8 = inlined_call_operand.vmem [shape: f32[3,256], index: 8, kind: input, shape index: {}]   ;;  %s1025_s9 = inlined_call_operand.hbm [shape: bf16[8,256], index: 9, kind: output, shape index: {}]  }
   0x1   :  { %15 = vsyncpa [#allocation6], 0 }
   0x2   :  { %16 = vsyncpa [#allocation9], 0 }
   0x3   :  { %17 = vsyncpa [#allocation4], 0  ;;  %s39_s11 = sshll.u32 %s1019_s3, 4  ;;  %s926_s12 = smov [#allocation5]   ;;  %s40_s11 = int_to_ptr.hbm [resolvable:$true] %s39_s11 }
   0x4   :  { %s41_s13 = sshll.u32 %s926_s12, 4  ;;  %s63_s16 = sshll.u32 %s1021_s5, 4  ;;  %s42_s13 = int_to_ptr.vmem [resolvable:$true] %s41_s13  ;;  %s64_s16 = int_to_ptr.hbm [resolvable:$true] %s63_s16 }
   0x5   :  { %s927_s17 = smov 64   ;;  %s928_s18 = smov 4  }
   0x6   :  { %47 = dma.hbm_to_vmem [thread:$0]  %s40_s11, 1024, %s42_s13, [#allocation6], %s927_s17, %s927_s17, %s928_s18  }
   0x7   :  { %s929_s19 = smov [#allocation8]   ;;  %s24_s23 = sshll.u32 %s1017_s1, 4  ;;  %s25_s23 = int_to_ptr.hbm [resolvable:$true] %s24_s23 }
   0x8   :  { %s65_s20 = sshll.u32 %s929_s19, 4  ;;  %s53_s25 = sshll.u32 %s1020_s4, 4  ;;  %s66_s20 = int_to_ptr.vmem [resolvable:$true] %s65_s20  ;;  %s54_s25 = int_to_ptr.hbm [resolvable:$true] %s53_s25 }
   0x9   :  { %71 = dma.hbm_to_vmem [thread:$0]  %s64_s16, 1024, %s66_s20, [#allocation9], %s927_s17, %s927_s17, %s928_s18  }
   0xa   :  { %s930_s26 = smov [#allocation2]   ;;  %s931_s5 = smov [#allocation7]  }
   0xb   :  { %s26_s27 = sshll.u32 %s930_s26, 4  ;;  %s55_s28 = sshll.u32 %s931_s5, 4  ;;  %s27_s27 = int_to_ptr.vmem [resolvable:$true] %s26_s27  ;;  %s56_s28 = int_to_ptr.vmem [resolvable:$true] %s55_s28 }
   0xc   :  { %32 = dma.hbm_to_vmem [thread:$0]  %s25_s23, 256, %s27_s27, [#allocation3], %s927_s17, %s927_s17, %s928_s18  }
   0xd   :  { %s78_s10 = sshll.u32 %s1023_s7, 4  ;;  %s932_s1 = smov [#allocation10]   ;;  %s79_s10 = int_to_ptr.hbm [resolvable:$true] %s78_s10 }
   0xe   :  { %58 = dma.hbm_to_vmem [thread:$0]  %s54_s25, 64, %s56_s28, [#allocation6]  }
   0xf   :  { %s80_s11 = sshll.u32 %s932_s1, 4  ;;  %s933_s12 = smov 128   ;;  %s81_s11 = int_to_ptr.vmem [resolvable:$true] %s80_s11 }
  0x10   :  { %s934_s13 = smov 8  }
  0x11   :  { %86 = dma.hbm_to_vmem [thread:$0]  %s79_s10, 2048, %s81_s11, [#allocation9], %s933_s12, %s933_s12, %s934_s13  }
  0x12   :  { %918 = dma.done.wait [#allocation3], 256  }
  0x13   :  { %919 = vsyncadd [#allocation3], 4294967040 }
  0x14   :  { %920 = dma.done.wait [#allocation6], 1088  }
  0x15   :  { %921 = vsyncadd [#allocation6], 4294966208 }
  0x16   :  { %922 = dma.done.wait [#allocation9], 3072  }
  0x17   :  { %923 = vsyncadd [#allocation9], 4294964224  ;;  %v731_v0 = vld [vmem:[#allocation2 + $0x8] sm:$0xff]  ;;  %v730_v2 = vld [vmem:[#allocation2] sm:$0xff]  ;;  %vm129_vm0 = vcmask 261120   ;;  %s581_s20 = sshll.u32 %s1025_s9, 4  ;;  %s582_s20 = int_to_ptr.hbm [resolvable:$true] %s581_s20 }
  0x18   :  { %v739_v1 = vld [vmem:[#allocation5 + $0x38] sm:$0xff]  ;;  %139 = vmatpush.bf16.msra.mxu0 %v731_v0  ;;  %v738_v3 = vld [vmem:[#allocation5 + $0x30] sm:$0xff]  ;;  %v110_v4 = vld [vmem:[%s1016_s0] sm:$0xf] }
  0x19   :  { %240 = vmatpush.bf16.msra.mxu1 %v739_v1  ;;  %v737_v5 = vld [vmem:[#allocation5 + $0x28] sm:$0xff]  ;;  %v736_v6 = vld [vmem:[#allocation5 + $0x20] sm:$0xff]  ;;  %v735_v7 = vld [vmem:[#allocation5 + $0x18] sm:$0xff] }
  0x1a   :  { %v734_v8 = vld [vmem:[#allocation5 + $0x10] sm:$0xff]  ;;  %v733_v9 = vld [vmem:[#allocation5 + $0x8] sm:$0xff]  ;;  %v732_v11 = vld [vmem:[#allocation5] sm:$0xff] }
  0x1b   :  { %v115_v10 = vld [vmem:[%s1018_s2] sm:$0x7]  ;;  %v747_v14 = vld [vmem:[#allocation8 + $0x38] sm:$0xff]  ;;  %v746_v15 = vld [vmem:[#allocation8 + $0x30] sm:$0xff] }
  0x1c   :  { %140 = vmatpush.bf16.msra.mxu0 %v730_v2  ;;  %v116_v12 = vpack.c.bf16 %v115_v10, %v115_v10  ;;  %347 = vmatpush.bf16.msra.mxu2 %v747_v14  ;;  %v745_v38 = vld [vmem:[#allocation8 + $0x28] sm:$0xff]  ;;  %v744_v39 = vld [vmem:[#allocation8 + $0x20] sm:$0xff]  ;;  %v743_v40 = vld [vmem:[#allocation8 + $0x18] sm:$0xff] }
  0x1d   :  { %241 = vmatpush.bf16.msra.mxu1 %v738_v3  ;;  %v742_v41 = vld [vmem:[#allocation8 + $0x10] sm:$0xff]  ;;  %v741_v42 = vld [vmem:[#allocation8 + $0x8] sm:$0xff]  ;;  %v190_v43 = vld [vmem:[#allocation7] sm:$0x7] }
  0x1e   :  { %v148_v13 = vpack.i.b16 %v116_v12, %v116_v12  ;;  %v158_v17 = vshrl.u32 %v116_v12, 16  ;;  %v740_v44 = vld [vmem:[#allocation8] sm:$0xff]  ;;  %v191_v45 = vpack.c.bf16 %v190_v43, %v190_v43  ;;  %v724_v47 = vld [vmem:[#allocation10 + $0x70] sm:$0xf]  ;;  %v763_v48 = vld [vmem:[#allocation10 + $0x74] sm:$0xf0] }
  0x1f   :  { %601 = vmatmul.msk.bf16.vlgmr.msra.gmra.mxu0 %vm129_vm0, %v110_v4  ;;  %v762_v49 = vld [vmem:[#allocation10 + $0x74] sm:$0xf]  ;;  %v725_v50 = vor.u32 %v763_v48, %v724_v47  ;;  %v726_v51 = vld [vmem:[#allocation10 + $0x78] sm:$0xf0]  ;;  %v716_v52 = vld [vmem:[#allocation10 + $0x60] sm:$0xf] }
  0x20   :  { %v150_v16 = vperm.slane %v148_v13, 0  ;;  %348 = vmatpush.bf16.msra.mxu2 %v746_v15  ;;  %v159_v21 = vpack.i.b16 %v158_v17, %v158_v17  ;;  %v166_v30 = vperm.slane %v148_v13, 1  ;;  %v255_v46 = vpack.i.b16 %v191_v45, %v191_v45  ;;  %v761_v53 = vld [vmem:[#allocation10 + $0x64] sm:$0xf0]  ;;  %v760_v55 = vld [vmem:[#allocation10 + $0x64] sm:$0xf] }
  0x21   :  { %242 = vmatpush.bf16.msra.mxu1 %v737_v5  ;;  %v729_v54 = vor.u32 %v762_v49, %v726_v51  ;;  %v718_v56 = vld [vmem:[#allocation10 + $0x68] sm:$0xf0]  ;;  %492 = vmatpush.bf16.msra.mxu3 %v725_v50  ;;  %v717_v57 = vor.u32 %v761_v53, %v716_v52  ;;  %v265_v59 = vshrl.u32 %v191_v45, 16  ;;  %v708_v17 = vld [vmem:[#allocation10 + $0x50] sm:$0xf] }
  0x22   :  { %v152_v20 = vunpack.c.l.bf16 %v150_v16  ;;  %v161_v24 = vperm.slane %v159_v21, 0  ;;  %v168_v33 = vunpack.c.l.bf16 %v166_v30  ;;  %v257_v58 = vperm.slane %v255_v46, 0  ;;  %v710_v21 = vld [vmem:[#allocation10 + $0x58] sm:$0xf0]  ;;  %v755_v30 = vld [vmem:[#allocation10 + $0x34] sm:$0xf0] }
  0x23   :  { %505 = vmatpush.bf16.msrb.mxu0 %v729_v54  ;;  %v721_v60 = vor.u32 %v760_v55, %v718_v56  ;;  %v266_v0 = vpack.i.b16 %v265_v59, %v265_v59  ;;  %v750_v43 = vld [vmem:[#allocation10 + $0x14] sm:$0xf]  ;;  %v668_v47 = vld [vmem:[#allocation10] sm:$0xf]  ;;  %v749_v48 = vld [vmem:[#allocation10 + $0x4] sm:$0xf0] }
  0x24   :  { %v163_v28 = vunpack.c.l.bf16 %v161_v24  ;;  %349 = vmatpush.bf16.msra.mxu2 %v745_v38  ;;  %v259_v63 = vunpack.c.l.bf16 %v257_v58  ;;  %v757_v24 = vld [vmem:[#allocation10 + $0x44] sm:$0xf0]  ;;  %v748_v49 = vld [vmem:[#allocation10 + $0x4] sm:$0xf]  ;;  %v670_v50 = vld [vmem:[#allocation10 + $0x8] sm:$0xf0]  ;;  %v669_v52 = vor.u32 %v749_v48, %v668_v47 }
  0x25   :  { %243 = vmatpush.bf16.msra.mxu1 %v736_v6  ;;  %493 = vmatpush.bf16.msra.mxu3 %v717_v57  ;;  %v268_v3 = vperm.slane %v266_v0, 0  ;;  %v297_v51 = vld [vmem:[%s1022_s6] sm:$0x7]  ;;  %v673_v53 = vor.u32 %v748_v49, %v670_v50 }
  0x26   :  { %v298_v54 = vpack.c.bf16 %v297_v51, %v297_v51 }
  0x27   :  { %506 = vmatpush.bf16.msrb.mxu0 %v721_v60 }
  0x28   :  { %350 = vmatpush.bf16.msra.mxu2 %v744_v39  ;;  %v686_v39 = vld [vmem:[#allocation10 + $0x28] sm:$0xf0]  ;;  %v362_v55 = vpack.i.b16 %v298_v54, %v298_v54  ;;  %v372_v57 = vshrl.u32 %v298_v54, 16 }
  0x29   :  { %244 = vmatpush.bf16.msra.mxu1 %v735_v7  ;;  %v270_v7 = vunpack.c.l.bf16 %v268_v3 }
  0x2a   :  { %v364_v56 = vperm.slane %v362_v55, 0 }
  0x2c   :  { %351 = vmatpush.bf16.msra.mxu2 %v743_v40  ;;  %v676_v40 = vld [vmem:[#allocation10 + $0x10] sm:$0xf]  ;;  %v366_v60 = vunpack.c.l.bf16 %v364_v56 }
  0x2d   :  { %245 = vmatpush.bf16.msra.mxu1 %v734_v8 }
  0x30   :  { %352 = vmatpush.bf16.msra.mxu2 %v742_v41  ;;  %v751_v41 = vld [vmem:[#allocation10 + $0x14] sm:$0xf0] }
  0x31   :  { %246 = vmatpush.bf16.msra.mxu1 %v733_v9  ;;  %v273_v9 = vperm.slane %v255_v46, 1  ;;  %v677_v45 = vor.u32 %v751_v41, %v676_v40 }
  0x33   :  { %v275_v12 = vunpack.c.l.bf16 %v273_v9 }
  0x34   :  { %353 = vmatpush.bf16.msra.mxu2 %v741_v42 }
  0x35   :  { %247 = vmatpush.bf16.msra.mxu1 %v732_v11 }
  0x38   :  { %354 = vmatpush.bf16.msra.mxu2 %v740_v44  ;;  %v678_v44 = vld [vmem:[#allocation10 + $0x18] sm:$0xf0] }
  0x39   :  { %v681_v46 = vor.u32 %v750_v43, %v678_v44 }
  0x9c   :  { %v142_v18 = vpop.f32.mrf.mxu0 }
  0x9d   :  { %v146_v19 = vpack.c.bf16 %v142_v18, %v142_v18  ;;  %v759_v18 = vld [vmem:[#allocation10 + $0x54] sm:$0xf0] }
  0x9f   :  { %v151_v22 = vunpack.c.l.bf16 %v146_v19  ;;  %v758_v19 = vld [vmem:[#allocation10 + $0x54] sm:$0xf] }
  0xa1   :  { %v153_v23 = vadd.f32 %v152_v20, %v151_v22  ;;  %v709_v20 = vor.u32 %v759_v18, %v708_v17  ;;  %v713_v22 = vor.u32 %v758_v19, %v710_v21 }
  0xa3   :  { %v156_v25 = vmax.f32 %v153_v23, 0.0  ;;  %494 = vmatpush.bf16.msra.mxu3 %v709_v20  ;;  %507 = vmatpush.bf16.msrb.mxu0 %v713_v22  ;;  %v700_v23 = vld [vmem:[#allocation10 + $0x40] sm:$0xf] }
  0xa4   :  { %v144_v26 = vpop.f32.mrf.mxu0 }
  0xa5   :  { %v157_v27 = vpack.c.bf16 %v156_v25, %v156_v25  ;;  %v756_v25 = vld [vmem:[#allocation10 + $0x44] sm:$0xf]  ;;  %v701_v26 = vor.u32 %v757_v24, %v700_v23 }
  0xa7   :  { %v162_v29 = vunpack.c.l.bf16 %v157_v27  ;;  %v702_v27 = vld [vmem:[#allocation10 + $0x48] sm:$0xf0]  ;;  %495 = vmatpush.bf16.msra.mxu3 %v701_v26 }
  0xa9   :  { %v164_v31 = vmul.f32 %v163_v28, %v162_v29  ;;  %v705_v28 = vor.u32 %v756_v25, %v702_v27  ;;  %v692_v29 = vld [vmem:[#allocation10 + $0x30] sm:$0xf] }
  0xab   :  { %v165_v32 = vpack.c.bf16 %v164_v31, %v164_v31  ;;  %508 = vmatpush.bf16.msrb.mxu0 %v705_v28  ;;  %v754_v31 = vld [vmem:[#allocation10 + $0x34] sm:$0xf] }
  0xad   :  { %v167_v34 = vunpack.c.l.bf16 %v165_v32  ;;  %v693_v32 = vor.u32 %v755_v30, %v692_v29 }
  0xaf   :  { %v169_v35 = vadd.f32 %v168_v33, %v167_v34  ;;  %v694_v33 = vld [vmem:[#allocation10 + $0x38] sm:$0xf0]  ;;  %496 = vmatpush.bf16.msra.mxu3 %v693_v32 }
  0xb0   :  { %v697_v34 = vor.u32 %v754_v31, %v694_v33 }
  0xb1   :  { %v172_v36 = vmax.f32 %v169_v35, 0.0  ;;  %v684_v35 = vld [vmem:[#allocation10 + $0x20] sm:$0xf] }
  0xb2   :  { %509 = vmatpush.bf16.msrb.mxu0 %v697_v34 }
  0xb3   :  { %v173_v37 = vpack.c.bf16 %v172_v36, %v172_v36  ;;  %v753_v36 = vld [vmem:[#allocation10 + $0x24] sm:$0xf0] }
  0xb4   :  { %v685_v38 = vor.u32 %v753_v36, %v684_v35 }
  0xb5   :  { %248 = vmatmul.bf16.vlgmr.msra.gmra.mxu1 %v173_v37  ;;  %v752_v37 = vld [vmem:[#allocation10 + $0x24] sm:$0xf] }
  0xb6   :  { %v689_v42 = vor.u32 %v752_v37, %v686_v39  ;;  %497 = vmatpush.bf16.msra.mxu3 %v685_v38 }
  0xb8   :  { %510 = vmatpush.bf16.msrb.mxu0 %v689_v42 }
  0xba   :  { %498 = vmatpush.bf16.msra.mxu3 %v677_v45 }
  0xbc   :  { %511 = vmatpush.bf16.msrb.mxu0 %v681_v46 }
  0xbe   :  { %499 = vmatpush.bf16.msra.mxu3 %v669_v52 }
  0xc0   :  { %512 = vmatpush.bf16.msrb.mxu0 %v673_v53 }
 0x132   :  { %v249_v61 = vpop.f32.mrf.mxu1 }
 0x133   :  { %v253_v62 = vpack.c.bf16 %v249_v61, %v249_v61  ;;  %v373_v61 = vpack.i.b16 %v372_v57, %v372_v57 }
 0x135   :  { %v258_v1 = vunpack.c.l.bf16 %v253_v62  ;;  %v375_v0 = vperm.slane %v373_v61, 0 }
 0x137   :  { %v260_v2 = vadd.f32 %v259_v63, %v258_v1 }
 0x139   :  { %v263_v4 = vmax.f32 %v260_v2, 0.0 }
 0x13a   :  { %v251_v5 = vpop.f32.mrf.mxu1 }
 0x13b   :  { %v264_v6 = vpack.c.bf16 %v263_v4, %v263_v4  ;;  %v377_v4 = vunpack.c.l.bf16 %v375_v0 }
 0x13d   :  { %v269_v8 = vunpack.c.l.bf16 %v264_v6  ;;  %v380_v6 = vperm.slane %v362_v55, 1 }
 0x13f   :  { %v271_v10 = vmul.f32 %v270_v7, %v269_v8  ;;  %v382_v9 = vunpack.c.l.bf16 %v380_v6 }
 0x141   :  { %v272_v11 = vpack.c.bf16 %v271_v10, %v271_v10 }
 0x143   :  { %v274_v13 = vunpack.c.l.bf16 %v272_v11 }
 0x145   :  { %v276_v14 = vadd.f32 %v275_v12, %v274_v13 }
 0x147   :  { %v279_v15 = vmax.f32 %v276_v14, 0.0  ;;  %v404_v14 = vld [vmem:[%s1024_s8] sm:$0x77]  ;;  %s935_s8 = smov [#allocation11]  }
 0x148   :  { %406 = vst [vmem:[#allocation1] ss:$2 sm:$0xff] %v404_v14  ;;  %s579_s17 = sshll.u32 %s935_s8, 4  ;;  %s580_s17 = int_to_ptr.vmem [resolvable:$true] %s579_s17 }
 0x149   :  { %v280_v16 = vpack.c.bf16 %v279_v15, %v279_v15 }
 0x14b   :  { %355 = vmatmul.bf16.vlgmr.msra.gmra.mxu2 %v280_v16 }
 0x14f   :  { %v407_v15 = vld.sshfl [vmem:[#allocation1] sm:$0xff pattern:$0x75316420]  ;;  %v408_v16 = vld.sshfl [vmem:[#allocation1 + $0x8] sm:$0xff pattern:$0x75316420] }
 0x150   :  { %v411_v17 = vpack.c.bf16 %v408_v16, %v407_v15 }
 0x152   :  { %v520_v18 = vunpack.c.l.b16 %v411_v17  ;;  %v521_v19 = vunpack.c.h.b16 %v411_v17 }
 0x154   :  { %v522_v20 = vpack.c.b16 %v520_v18, %v520_v18  ;;  %v523_v21 = vpack.c.b16 %v521_v19, %v521_v19 }
 0x156   :  { %v525_v22 = vpack.i.b16 %v522_v20, %v522_v20  ;;  %v529_v23 = vpack.i.b16 %v523_v21, %v523_v21  ;;  %v544_v27 = vshrl.u32 %v522_v20, 16  ;;  %v548_v28 = vshrl.u32 %v523_v21, 16 }
 0x158   :  { %v527_v25 = vperm.slane %v525_v22, 0  ;;  %v531_v26 = vperm.slane %v529_v23, 0  ;;  %v545_v33 = vpack.i.b16 %v544_v27, %v544_v27  ;;  %v549_v34 = vpack.i.b16 %v548_v28, %v548_v28 }
 0x159   :  { %v559_v50 = vperm.slane %v525_v22, 1  ;;  %v560_v51 = vperm.slane %v529_v23, 1 }
 0x15a   :  { %v534_v30 = vunpack.c.l.bf16 %v527_v25  ;;  %v535_v32 = vunpack.c.l.bf16 %v531_v26  ;;  %v547_v40 = vperm.slane %v545_v33, 0  ;;  %v551_v41 = vperm.slane %v549_v34, 0 }
 0x15b   :  { %v563_v55 = vunpack.c.l.bf16 %v559_v50  ;;  %v564_v56 = vunpack.c.l.bf16 %v560_v51 }
 0x15c   :  { %v554_v46 = vunpack.c.l.bf16 %v547_v40  ;;  %v555_v47 = vunpack.c.l.bf16 %v551_v41 }
 0x1ce   :  { %v356_v58 = vpop.f32.mrf.mxu2 }
 0x1cf   :  { %v360_v59 = vpack.c.bf16 %v356_v58, %v356_v58 }
 0x1d1   :  { %v365_v62 = vunpack.c.l.bf16 %v360_v59 }
 0x1d3   :  { %v367_v63 = vadd.f32 %v366_v60, %v365_v62 }
 0x1d5   :  { %v370_v1 = vmax.f32 %v367_v63, 0.0 }
 0x1d6   :  { %v358_v2 = vpop.f32.mrf.mxu2 }
 0x1d7   :  { %v371_v3 = vpack.c.bf16 %v370_v1, %v370_v1 }
 0x1d9   :  { %v376_v5 = vunpack.c.l.bf16 %v371_v3 }
 0x1db   :  { %v378_v7 = vmul.f32 %v377_v4, %v376_v5 }
 0x1dd   :  { %v379_v8 = vpack.c.bf16 %v378_v7, %v378_v7 }
 0x1df   :  { %v381_v10 = vunpack.c.l.bf16 %v379_v8 }
 0x1e1   :  { %v383_v11 = vadd.f32 %v382_v9, %v381_v10 }
 0x1e3   :  { %v386_v12 = vmax.f32 %v383_v11, 0.0 }
 0x1e5   :  { %v387_v13 = vpack.c.bf16 %v386_v12, %v386_v12 }
 0x1e7   :  { %500 = vmatmul.bf16.vlgmr.msra.gmra.mxu3 %v387_v13  ;;  %513 = vmatmul.bf16.vlgmr.msrb.gmra.mxu0 %v387_v13 }
 0x264   :  { %v514_v24 = vpop.f32.mrf.mxu0 }
 0x26a   :  { %v501_v29 = vpop.f32.mrf.mxu3 }
 0x26b   :  { %v518_v31 = vpack.c.bf16 %v514_v24, %v501_v29 }
 0x26c   :  { %v516_v35 = vpop.f32.mrf.mxu0 }
 0x26d   :  { %v532_v36 = vunpack.c.l.bf16 %v518_v31  ;;  %v533_v37 = vunpack.c.h.bf16 %v518_v31 }
 0x26f   :  { %v536_v38 = vadd.f32 %v534_v30, %v532_v36  ;;  %v537_v39 = vadd.f32 %v535_v32, %v533_v37 }
 0x271   :  { %v541_v42 = vmax.f32 %v536_v38, 0.0  ;;  %v542_v43 = vmax.f32 %v537_v39, 0.0 }
 0x272   :  { %v503_v44 = vpop.f32.mrf.mxu3 }
 0x273   :  { %v543_v45 = vpack.c.bf16 %v542_v43, %v541_v42 }
 0x275   :  { %v552_v48 = vunpack.c.l.bf16 %v543_v45  ;;  %v553_v49 = vunpack.c.h.bf16 %v543_v45 }
 0x277   :  { %v556_v52 = vmul.f32 %v554_v46, %v552_v48  ;;  %v557_v53 = vmul.f32 %v555_v47, %v553_v49 }
 0x279   :  { %v558_v54 = vpack.c.bf16 %v557_v53, %v556_v52 }
 0x27b   :  { %v561_v57 = vunpack.c.l.bf16 %v558_v54  ;;  %v562_v58 = vunpack.c.h.bf16 %v558_v54 }
 0x27d   :  { %v565_v59 = vadd.f32 %v563_v55, %v561_v57  ;;  %v566_v60 = vadd.f32 %v564_v56, %v562_v58 }
 0x27f   :  { %v570_v61 = vmax.f32 %v565_v59, 0.0  ;;  %v571_v62 = vmax.f32 %v566_v60, 0.0 }
 0x281   :  { %v572_v63 = vpack.c.bf16 %v571_v62, %v570_v61 }
 0x283   :  { %573 = vst [vmem:[#allocation11] sm:$0xff] %v572_v63 }
 0x284   :  { %584 = dma.vmem_to_hbm [thread:$0]  %s580_s17, 128, %s582_s20, [#allocation4]  }
 0x285   :  { %924 = dma.done.wait [#allocation4], 128  }
 0x286   :  { %925 = vsyncadd [#allocation4], 4294967168 }
 0x287   :  { %589 = vsyncpa [#allocation3], 1 }
 0x288   :  { %590 = vsyncpa [#allocation6], 1 }
 0x289   :  { %591 = vsyncpa [#allocation9], 1 }
 0x28a   :  { %592 = vsyncpa [#allocation4], 1 }

</bundles_post_ra>
